<compile_context>
chip_gen: v5e
topology: v5e:2x2
jax: 0.10.0
libtpu: 0.0.40
codegen_flags: <defaults>
</compile_context>

<pallas_src>
import jax
import jax.numpy as jnp
from jax.experimental import pallas as pl
from jax.experimental.pallas import tpu as pltpu


def _round_up(x, m):
    return ((x + m - 1) // m) * m


def _cdiv(a, b):
    return (a + b - 1) // b


# ---------------------------------------------------------------------------
# Kernels
# ---------------------------------------------------------------------------

def ffn_resident_kernel(x_ref, w1_ref, b1_ref, w2_ref, b2_ref, o_ref):
    """Weights-resident path: full d_ff reduction in one grid step (grid = rows)."""
    h = jnp.dot(x_ref[...], w1_ref[...], preferred_element_type=jnp.float32)
    h = jnp.maximum(h + b1_ref[...], 0.0)
    # dropout: identity (inference / eval mode)
    y = jnp.dot(h.astype(w2_ref.dtype), w2_ref[...],
                preferred_element_type=jnp.float32)
    o_ref[...] = (y + b2_ref[...]).astype(o_ref.dtype)


def ffn_stream_kernel(x_ref, w1_ref, b1_ref, w2_ref, b2_ref, o_ref, acc_ref):
    """Streaming path: d_ff tiled on the last ('arbitrary') grid axis; nk >= 2."""
    k = pl.program_id(1)
    nk = pl.num_programs(1)

    h = jnp.dot(x_ref[...], w1_ref[...], preferred_element_type=jnp.float32)
    h = jnp.maximum(h + b1_ref[...], 0.0)
    # dropout: identity (inference / eval mode)
    contrib = jnp.dot(h.astype(w2_ref.dtype), w2_ref[...],
                      preferred_element_type=jnp.float32)

    @pl.when(k == 0)
    def _():
        # First d_ff tile: write directly (no zero-init + accumulate round trip).
        acc_ref[...] = contrib

    @pl.when(jnp.logical_and(k > 0, k < nk - 1))
    def _():
        acc_ref[...] = acc_ref[...] + contrib

    @pl.when(k == nk - 1)
    def _():
        # nk >= 2, so acc_ref holds all prior partial sums; fuse the last
        # contribution and bias add with the output store.
        o_ref[...] = (acc_ref[...] + contrib + b2_ref[...]).astype(o_ref.dtype)


# ---------------------------------------------------------------------------
# Wrapper
# ---------------------------------------------------------------------------

def _vmem_capacity_bytes():
    """Best-effort VMEM capacity query; conservative fallback (v7x per-TC)."""
    try:
        info = pltpu.get_tpu_info()
        for attr in ("vmem_capacity_bytes", "vmem_size_bytes", "vmem_bytes"):
            v = getattr(info, attr, None)
            if v:
                return int(v)
    except Exception:
        pass
    return 64 * 1024 * 1024


def feed_forward_block(x, w1, b1, w2, b2, *, block_rows=None, tile_ff=512,
                       compute_dtype=None, force_streaming=False):
    """Fused Linear -> ReLU -> Dropout(identity) -> Linear.

    x:  (batch, seq, d_model)
    w1: (d_model, d_ff)   b1: (d_ff,)      (transpose of torch Linear.weight)
    w2: (d_ff, d_model)   b2: (d_model,)
    compute_dtype: optionally cast x/W1/W2 (e.g. jnp.bfloat16) for the MXU;
                   accumulation stays f32 and the output keeps the input dtype.
    """
    B, S, d_model = x.shape
    d_ff = w1.shape[1]
    M = B * S
    out_dtype = x.dtype                         # capture BEFORE any compute cast

    if compute_dtype is not None:
        x = x.astype(compute_dtype)
        w1 = w1.astype(compute_dtype)
        w2 = w2.astype(compute_dtype)

    in_item = x.dtype.itemsize
    w_item = w1.dtype.itemsize
    out_item = jnp.dtype(out_dtype).itemsize

    # --- per-generation VMEM budget ---------------------------------------
    vmem_cap = _vmem_capacity_bytes()
    vmem_limit = min(int(vmem_cap * 0.75), 96 * 1024 * 1024)

    # --- weights-resident vs streaming decision ----------------------------
    weights_bytes = 2 * d_model * d_ff * w_item
    resident = (weights_bytes <= vmem_limit // 3) and not force_streaming
    if d_ff < 256:
        resident = True   # too small to split into >= 2 lane-aligned d_ff tiles

    # --- d_ff tiling --------------------------------------------------------
    if resident:
        d_ff_pad = d_ff
        tf = d_ff
    else:
        d_ff_pad = _round_up(d_ff, 128)
        # Largest multiple of 128 <= tile_ff that divides d_ff_pad with >= 2 tiles.
        cap = max(128, min(_round_up(tile_ff, 128), (d_ff_pad // 2) // 128 * 128))
        tf = 128
        for cand in range(cap, 127, -128):
            if d_ff_pad % cand == 0:
                tf = cand
                break

    # --- row tiling ----------------------------------------------------------
    sub = 16 if x.dtype == jnp.bfloat16 else 8
    if block_rows is None:
        block_rows = 1024 if vmem_limit >= 64 * 1024 * 1024 else 512
    bm = max(sub, min(_round_up(block_rows, sub), _round_up(M, sub)))
    # Megacore / 2-TC: prefer >= 2 row tiles on the parallel axis when possible.
    if M > sub and _cdiv(M, bm) < 2:
        bm = max(sub, _round_up(_cdiv(M, 2), sub))

    def footprint(bm_, tf_):
        if resident:
            w_vmem = 2 * weights_bytes                       # conservative x2 bufs
            b_vmem = 2 * (d_ff_pad + d_model) * 4
            acc = 0
        else:
            w_vmem = 2 * 2 * d_model * tf_ * w_item          # W1 + W2 slabs, x2 bufs
            b_vmem = 2 * (tf_ + d_model) * 4
            acc = bm_ * d_model * 4
        return (w_vmem + b_vmem + acc
                + 2 * bm_ * d_model * in_item + 2 * bm_ * d_model * out_item)

    while footprint(bm, tf) > vmem_limit and bm > sub:
        bm = max(sub, _round_up(bm // 2, sub))
    if not resident:
        while footprint(bm, tf) > vmem_limit and tf > 128:
            new_tf = tf
            for c in range(tf - 128, 127, -128):
                if d_ff_pad % c == 0:
                    new_tf = c
                    break
            if new_tf == tf:
                break
            tf = new_tf

    M_pad = _round_up(M, bm)

    # --- host-side reshape / padding -----------------------------------------
    x2 = x.reshape(M, d_model)
    if M_pad != M:
        x2 = jnp.pad(x2, ((0, M_pad - M), (0, 0)))
    if d_ff_pad != d_ff:
        # TODO(synk): hoist this pad to parameter-init time; it copies the full
        # weight matrices in HBM on every call when d_ff % 128 != 0.
        w1 = jnp.pad(w1, ((0, 0), (0, d_ff_pad - d_ff)))
        b1 = jnp.pad(b1, ((0, d_ff_pad - d_ff),))
        w2 = jnp.pad(w2, ((0, d_ff_pad - d_ff), (0, 0)))

    b1_2d = b1.reshape(1, d_ff_pad).astype(jnp.float32)
    b2_2d = b2.reshape(1, d_model).astype(jnp.float32)

    n_row_tiles = M_pad // bm
    w_stream_factor = 1 if resident else n_row_tiles
    cost = pl.CostEstimate(
        flops=4 * M_pad * d_model * d_ff_pad,   # two matmuls, 2 flops/MAC
        transcendentals=0,
        bytes_accessed=(x2.size * in_item
                        + (w1.size + w2.size) * w_item * w_stream_factor
                        + b1_2d.size * 4 * w_stream_factor
                        + b2_2d.size * 4
                        + M_pad * d_model * out_item),
    )

    compiler_params = pltpu.CompilerParams(
        dimension_semantics=("parallel",) if resident else ("parallel", "arbitrary"),
        vmem_limit_bytes=vmem_limit,
    )

    if resident:
        out = pl.pallas_call(
            ffn_resident_kernel,
            out_shape=jax.ShapeDtypeStruct((M_pad, d_model), out_dtype),
            grid=(n_row_tiles,),
            in_specs=[
                pl.BlockSpec((bm, d_model), lambda i: (i, 0)),        # x row tile
                pl.BlockSpec((d_model, d_ff_pad), lambda i: (0, 0)),  # W1 resident
                pl.BlockSpec((1, d_ff_pad), lambda i: (0, 0)),        # b1 resident
                pl.BlockSpec((d_ff_pad, d_model), lambda i: (0, 0)),  # W2 resident
                pl.BlockSpec((1, d_model), lambda i: (0, 0)),         # b2 resident
            ],
            out_specs=pl.BlockSpec((bm, d_model), lambda i: (i, 0)),
            compiler_params=compiler_params,
            cost_estimate=cost,
        )(x2, w1, b1_2d, w2, b2_2d)
    else:
        out = pl.pallas_call(
            ffn_stream_kernel,
            out_shape=jax.ShapeDtypeStruct((M_pad, d_model), out_dtype),
            grid=(n_row_tiles, d_ff_pad // tf),
            in_specs=[
                pl.BlockSpec((bm, d_model), lambda i, k: (i, 0)),     # x row tile
                pl.BlockSpec((d_model, tf), lambda i, k: (0, k)),     # W1 d_ff slab
                pl.BlockSpec((1, tf), lambda i, k: (0, k)),           # b1 slab
                pl.BlockSpec((tf, d_model), lambda i, k: (k, 0)),     # W2 d_ff slab
                pl.BlockSpec((1, d_model), lambda i, k: (0, 0)),      # b2 resident
            ],
            out_specs=pl.BlockSpec((bm, d_model), lambda i, k: (i, 0)),
            scratch_shapes=[pltpu.VMEM((bm, d_model), jnp.float32)],
            compiler_params=compiler_params,
            cost_estimate=cost,
        )(x2, w1, b1_2d, w2, b2_2d)

    return out[:M].reshape(B, S, d_model)


# ---------------------------------------------------------------------------
# Reference / init helpers
# ---------------------------------------------------------------------------

def init_params(key, d_model, d_ff, dtype=jnp.float32):
    """Deterministic init mirroring nn.Linear's U(-1/sqrt(fan_in), 1/sqrt(fan_in))."""
    k1, k2, k3, k4 = jax.random.split(key, 4)
    lim1 = 1.0 / (d_model ** 0.5)
    lim2 = 1.0 / (d_ff ** 0.5)
    w1 = jax.random.uniform(k1, (d_model, d_ff), dtype, -lim1, lim1)
    b1 = jax.random.uniform(k2, (d_ff,), dtype, -lim1, lim1)
    w2 = jax.random.uniform(k3, (d_ff, d_model), dtype, -lim2, lim2)
    b2 = jax.random.uniform(k4, (d_model,), dtype, -lim2, lim2)
    return w1, b1, w2, b2


def feed_forward_ref(x, w1, b1, w2, b2):
    h = jnp.maximum(x @ w1 + b1, 0.0)
    return h @ w2 + b2


if __name__ == "__main__":
    key = jax.random.PRNGKey(0)
    kx, kp, kx2, kp2 = jax.random.split(key, 4)

    # 1) Small shapes, weights-resident path, f32.
    B, S, d_model, d_ff = 2, 8, 32, 64
    x = jax.random.normal(kx, (B, S, d_model), jnp.float32)
    w1, b1, w2, b2 = init_params(kp, d_model, d_ff)
    out = jax.block_until_ready(feed_forward_block(x, w1, b1, w2, b2))
    ref = feed_forward_ref(x, w1, b1, w2, b2)
    assert out.shape == (B, S, d_model) and out.dtype == jnp.float32
    assert jnp.allclose(out, ref, atol=1e-5, rtol=1e-5), "resident-path mismatch"

    # 2) Ragged batch*seq exercises row padding / output-slice path.
    xr = jax.random.normal(kx, (3, 5, d_model), jnp.float32)
    out_r = jax.block_until_ready(feed_forward_block(xr, w1, b1, w2, b2))
    ref_r = feed_forward_ref(xr, w1, b1, w2, b2)
    assert out_r.shape == (3, 5, d_model)
    assert jnp.allclose(out_r, ref_r, atol=1e-5, rtol=1e-5), "ragged mismatch"

    # 3) Streaming (d_ff-tiled) path with the f32 VMEM accumulator.
    d_model2, d_ff2 = 128, 512
    x2 = jax.random.normal(kx2, (B, S, d_model2), jnp.float32)
    p2 = init_params(kp2, d_model2, d_ff2)
    out_s = jax.block_until_ready(
        feed_forward_block(x2, *p2, tile_ff=256, force_streaming=True))
    ref_s = feed_forward_ref(x2, *p2)
    assert jnp.allclose(out_s, ref_s, atol=1e-4, rtol=1e-4), "streaming mismatch"

    # 4) bf16 compute: f32 accumulation, output dtype preserved as f32.
    out_b = jax.block_until_ready(
        feed_forward_block(x, w1, b1, w2, b2, compute_dtype=jnp.bfloat16))
    assert out_b.dtype == jnp.float32
    assert jnp.allclose(out_b, ref, atol=5e-2, rtol=5e-2), "bf16 mismatch"

    print("KERNEL_OK")
</pallas_src>

<mosaic_0001>
module attributes {stable_mosaic.version = 11 : i64} {
  func.func @ffn_resident_kernel(%arg0: i32, %arg1: memref<8x32xf32, #tpu.memory_space<vmem>>, %arg2: memref<32x64xf32, #tpu.memory_space<vmem>>, %arg3: memref<1x64xf32, #tpu.memory_space<vmem>>, %arg4: memref<64x32xf32, #tpu.memory_space<vmem>>, %arg5: memref<1x32xf32, #tpu.memory_space<vmem>>, %arg6: memref<8x32xf32, #tpu.memory_space<vmem>>) attributes {dimension_semantics = [#tpu.dimension_semantics<parallel>], iteration_bounds = array<i64: 2>, scalar_prefetch = 0 : i64, scratch_operands = 0 : i64, tpu.core_type = #tpu.core_type<tc>, window_params = [{transform_indices = @transform_0, window_bounds = array<i64: 8, 32>}, {pipeline_mode = #tpu.pipeline_mode<synchronous>, transform_indices = @transform_1, window_bounds = array<i64: 32, 64>}, {pipeline_mode = #tpu.pipeline_mode<synchronous>, transform_indices = @transform_2, window_bounds = array<i64: 1, 64>}, {pipeline_mode = #tpu.pipeline_mode<synchronous>, transform_indices = @transform_3, window_bounds = array<i64: 64, 32>}, {pipeline_mode = #tpu.pipeline_mode<synchronous>, transform_indices = @transform_4, window_bounds = array<i64: 1, 32>}, {transform_indices = @transform_5, window_bounds = array<i64: 8, 32>}]} {
    %c0 = arith.constant 0 : index
    %c0_0 = arith.constant 0 : index
    %0 = vector.load %arg1[%c0, %c0_0] : memref<8x32xf32, #tpu.memory_space<vmem>>, vector<8x32xf32>
    %c0_1 = arith.constant 0 : index
    %c0_2 = arith.constant 0 : index
    %1 = vector.load %arg2[%c0_1, %c0_2] : memref<32x64xf32, #tpu.memory_space<vmem>>, vector<32x64xf32>
    %cst = arith.constant dense<0.000000e+00> : vector<8x64xf32>
    %2 = tpu.matmul %0, %1, %cst {dimension_numbers = #tpu.dot_dimension_numbers<[1], [0], [0], [1], [0, 0, 1, 1], [], []>} : vector<8x32xf32>, vector<32x64xf32>, vector<8x64xf32> -> vector<8x64xf32>
    %c0_3 = arith.constant 0 : index
    %c0_4 = arith.constant 0 : index
    %3 = vector.load %arg3[%c0_3, %c0_4] : memref<1x64xf32, #tpu.memory_space<vmem>>, vector<1x64xf32>
    %4 = vector.broadcast %3 : vector<1x64xf32> to vector<8x64xf32>
    %5 = arith.addf %2, %4 : vector<8x64xf32>
    %cst_5 = arith.constant 0.000000e+00 : f32
    %6 = vector.broadcast %cst_5 : f32 to vector<8x64xf32>
    %7 = arith.maximumf %5, %6 : vector<8x64xf32>
    %c0_6 = arith.constant 0 : index
    %c0_7 = arith.constant 0 : index
    %8 = vector.load %arg4[%c0_6, %c0_7] : memref<64x32xf32, #tpu.memory_space<vmem>>, vector<64x32xf32>
    %cst_8 = arith.constant dense<0.000000e+00> : vector<8x32xf32>
    %9 = tpu.matmul %7, %8, %cst_8 {dimension_numbers = #tpu.dot_dimension_numbers<[1], [0], [0], [1], [0, 0, 1, 1], [], []>} : vector<8x64xf32>, vector<64x32xf32>, vector<8x32xf32> -> vector<8x32xf32>
    %c0_9 = arith.constant 0 : index
    %c0_10 = arith.constant 0 : index
    %10 = vector.load %arg5[%c0_9, %c0_10] : memref<1x32xf32, #tpu.memory_space<vmem>>, vector<1x32xf32>
    %11 = vector.broadcast %10 : vector<1x32xf32> to vector<8x32xf32>
    %12 = arith.addf %9, %11 : vector<8x32xf32>
    %c0_11 = arith.constant 0 : index
    %c0_12 = arith.constant 0 : index
    %13 = vector.load %arg6[%c0_11, %c0_12] : memref<8x32xf32, #tpu.memory_space<vmem>>, vector<8x32xf32>
    tpu.vector_store %arg6[%c0_11, %c0_12], %12 {strides = array<i32>} : memref<8x32xf32, #tpu.memory_space<vmem>>, vector<8x32xf32>,
    return
  }
  func.func @transform_0(%arg0: i32) -> (i32, i32) {
    %c0_i32 = arith.constant 0 : i32
    %c0_i32_0 = arith.constant 0 : i32
    return %arg0, %c0_i32 : i32, i32
  }
  func.func @transform_1(%arg0: i32) -> (i32, i32) {
    %c0_i32 = arith.constant 0 : i32
    %c0_i32_0 = arith.constant 0 : i32
    %c0_i32_1 = arith.constant 0 : i32
    return %c0_i32, %c0_i32_0 : i32, i32
  }
  func.func @transform_2(%arg0: i32) -> (i32, i32) {
    %c0_i32 = arith.constant 0 : i32
    %c0_i32_0 = arith.constant 0 : i32
    %c0_i32_1 = arith.constant 0 : i32
    return %c0_i32, %c0_i32_0 : i32, i32
  }
  func.func @transform_3(%arg0: i32) -> (i32, i32) {
    %c0_i32 = arith.constant 0 : i32
    %c0_i32_0 = arith.constant 0 : i32
    %c0_i32_1 = arith.constant 0 : i32
    return %c0_i32, %c0_i32_0 : i32, i32
  }
  func.func @transform_4(%arg0: i32) -> (i32, i32) {
    %c0_i32 = arith.constant 0 : i32
    %c0_i32_0 = arith.constant 0 : i32
    %c0_i32_1 = arith.constant 0 : i32
    return %c0_i32, %c0_i32_0 : i32, i32
  }
  func.func @transform_5(%arg0: i32) -> (i32, i32) {
    %c0_i32 = arith.constant 0 : i32
    %c0_i32_0 = arith.constant 0 : i32
    return %arg0, %c0_i32 : i32, i32
  }
}

</mosaic_0001>

<bundles_post_ra>
// kernel: tpu_custom_call.1
= control target key start
LH: loop header
LB: loop body
LE: loop exit
PB: predicated region body
PF: predicated region fallthrough
CT: control target
= control target key end

     0   :  { %10 = vsyncpa [#allocation3], 0  ;;  %s642_s0 = inlined_call_operand.vmem [shape: f32[16,32], index: 0, kind: input, shape index: {}]   ;;  %s643_s1 = inlined_call_operand.vmem [shape: f32[32,64], index: 1, kind: input, shape index: {}]   ;;  %s644_s2 = inlined_call_operand.vmem [shape: f32[1,64], index: 2, kind: input, shape index: {}]   ;;  %s645_s3 = inlined_call_operand.vmem [shape: f32[64,32], index: 3, kind: input, shape index: {}]   ;;  %s646_s4 = inlined_call_operand.vmem [shape: f32[1,32], index: 4, kind: input, shape index: {}]   ;;  %s647_s5 = inlined_call_operand.hbm [shape: f32[16,32], index: 5, kind: output, shape index: {}]  }
   0x1   :  { %12 = vsyncpa [#allocation3 + $0x1], 0  ;;  %s513_s18 = smov 0   ;;  %s515_s19 = smov 0  }
   0x2   :  { %s517_s20 = smov 0   ;;  %s519_s21 = smov 0  }
   0x3 LB: > { %s534_s22 = sadd.s32 4294967295, %s481_s21   ;;  %s366_s23 = sadd.s32 4294967294, %s481_s21   ;;  %s481_s21 = sphi %s519_s21, %s653_s21   ;;  %s477_s20 = sphi %s517_s20, %s652_s20   ;;  %s473_s19 = sphi %s515_s19, %s651_s19   ;;  %s469_s18 = sphi %s513_s18, %s650_s18  }
   0x4   : > { %s538_s24 = sadd.s32 1, %s481_s21   ;;  %s135_s25 = sadd.s32 1, %s477_s20 }
   0x5   : > { %s132_s26 = ssub.s32 %s481_s21, %s538_s24  ;;  %p145_p0 = scmp.ne.s32.totalorder %s477_s20, %s473_s19 }
   0x6   : > { %p133_p1 = scmp.eq.s32.totalorder %s132_s26, 0  ;;  %p146_p2 = scmp.eq.s32.totalorder %s534_s22, 1 }
   0x7   : > { %p151_p3 = scmp.ne.s32.totalorder %s473_s19, %s469_s18  ;;  %p152_p4 = scmp.eq.s32.totalorder %s366_s23, 1 }
   0x8   : > { %s549_s27 = scalar_select %p133_p1, %s477_s20, %s135_s25  }
   0x9   : > { %p551_p5 = por %p146_p2, %p145_p0  ;;  %p555_p6 = por %p152_p4, %p151_p3 }
   0xa   : > { %p369_p7 = scmp.ge.s32.totalorder %s481_s21, 1  ;;  %p189_p8 = scmp.lt.s32.totalorder %s481_s21, 3 }
   0xc   : > { %p190_p9 = pnand %p369_p7, %p189_p8 }
   0xd   : > { %p216_p10 = scmp.lt.s32.totalorder (!%p190_p9), %s534_s22, 1  ;;  %s375_s6 = sshll.u32 (!%p190_p9), %s534_s22, 3 }
   0xe   : > { %193 = sbr.rel (%p190_p9) target bundleno = 288 (0x120), region = 40  ;;  %s302_s9 = scalar_lea.hbm (!%p190_p9), %s647_s5, %s375_s6 }
   0xf   : > { %s306_s14 = sshll.u32 (!%p190_p9), %s302_s9, 4  ;;  %s439_s25 = scalar_lea.hbm (!%p190_p9), %s647_s5, 16  ;;  %s307_s14 = int_to_ptr.hbm [resolvable:$true] %s306_s14 }
  0x13   : > { %v224_v0 = vld [vmem:[%s643_s1 + $0x18] sm:$0xff]  ;;  %v223_v1 = vld [vmem:[%s643_s1 + $0x10] sm:$0xff]  ;;  %v222_v4 = vld [vmem:[%s643_s1 + $0x8] sm:$0xff]  ;;  %s217_s15 = scalar_select %p216_p10, %s534_s22, 1  ;;  %vm229_vm0 = vcmask 261120   ;;  %vm266_vm1 = vcmask 523264  }
  0x14   : > { %245 = vmatpush.msra.mxu0 %v224_v0  ;;  %v261_v2 = vld [vmem:[%s645_s3 + $0x38] sm:$0xff]  ;;  %v260_v3 = vld [vmem:[%s645_s3 + $0x30] sm:$0xff]  ;;  %v259_v5 = vld [vmem:[%s645_s3 + $0x28] sm:$0xff]  ;;  %s433_s22 = sshra.s32 %s307_s14, 4  ;;  %s434_s22 = int_to_ptr.hbm [resolvable:$true] %s433_s22 }
  0x15   : > { %278 = vmatpush.msra.mxu1 %v261_v2  ;;  %v221_v6 = vld [vmem:[%s643_s1] sm:$0xff]  ;;  %s371_s26 = sshll.u32 %s217_s15, 3  ;;  %v257_v9 = vld [vmem:[%s645_s3 + $0x18] sm:$0xff]  ;;  %v256_v10 = vld [vmem:[%s645_s3 + $0x10] sm:$0xff]  ;;  %s435_s16 = scalar_lea.hbm %s434_s22, 8 }
  0x16   : > { %246 = vmatpush.msra.mxu0 %v223_v1  ;;  %s219_s7 = scalar_lea.vmem %s642_s0, %s371_s26  ;;  %v258_v7 = vld [vmem:[%s645_s3 + $0x20] sm:$0xff]  ;;  %v255_v11 = vld [vmem:[%s645_s3 + $0x8] sm:$0xff]  ;;  %s213_s26 = sand.u32 1, %s473_s19  }
  0x17   : > { %279 = vmatpush.msra.mxu1 %v260_v3  ;;  %v220_v8 = vld [vmem:[%s219_s7] sm:$0xff]  ;;  %s370_s30 = sshll.u32 %s213_s26, 3  ;;  %s292_s15 = scalar_lea.sflag [#allocation3], %s213_s26 }
  0x18   : > { %247 = vmatpush.msra.mxu0 %v222_v4  ;;  %v254_v12 = vld [vmem:[%s645_s3] sm:$0xff]  ;;  %s215_s12 = scalar_lea.vmem [#allocation2], %s370_s30  ;;  %p436_p11 = scmp.ne.s32.totalorder %s434_s22, %s435_s16 }
  0x19   : > { %280 = vmatpush.msra.mxu1 %v259_v5  ;;  %v417_v13 = vld [vmem:[%s644_s2] ss:$0 sm:$0xff]  ;;  %s304_s13 = sshll.u32 %s215_s12, 4  ;;  %p440_p0 = scmp.lt.s32.totalorder %s434_s22, %s647_s5  ;;  %s305_s13 = int_to_ptr.vmem [resolvable:$true] %s304_s13 }
  0x1a   : > { %248 = vmatpush.msra.mxu0 %v221_v6  ;;  %v418_v17 = vld [vmem:[%s646_s4] ss:$0 sm:$0xff]  ;;  %p437_p12 = pnand %p436_p11, %p551_p5  ;;  %p441_p1 = scmp.lt.s32.totalorder %s439_s25, %s435_s16 }
  0x1b   : > { %372 = vmatmul.msk.f32.vlgmr.msra.gmra.mxu0 %vm229_vm0, %v220_v8  ;;  %281 = vmatpush.msra.mxu1 %v258_v7 }
  0x1c   : > { %p438_p13 = pneg %p437_p12  ;;  %p442_p2 = por %p441_p1, %p440_p0 }
  0x1d   : > { %282 = vmatpush.msra.mxu1 %v257_v9 }
  0x1e   : > { %p443_p3 = pnand %p442_p2, %p438_p13 }
  0x1f   : > { %283 = vmatpush.msra.mxu1 %v256_v10 }
  0x21   : > { %284 = vmatpush.msra.mxu1 %v255_v11 }
  0x23   : > { %285 = vmatpush.msra.mxu1 %v254_v12 }
  0x98   : > { %v250_v14 = vpop.f32.mrf.mxu0 }
  0x99   : > { %v251_v15 = vadd.f32 %v417_v13, %v250_v14 }
  0x9b   : > { %v253_v16 = vmax.f32 %v251_v15, 0.0 }
  0x9d   : > { %373 = vmatmul.msk.f32.vlgmr.msra.gmra.mxu1 %vm266_vm1, %v253_v16 }
 0x11a   : > { %v287_v18 = vpop.f32.mrf.mxu1 }
 0x11b   : > { %v288_v19 = vadd.f32 %v418_v17, %v287_v18 }
 0x11d   : > { %290 = vst.msk [vmem:[%s215_s12] sm:$0xff] %vm229_vm0, %v288_v19 }
 0x11e   : > { %446 = shalt.err (!%p443_p3)
}
 0x11f   : > { %378 = dma.vmem_to_hbm [thread:$0]  (%p551_p5), %s305_s13, 128, %s307_s14, %s292_s15  }
 0x120 PF: > { %p384_p4 = scmp.ge.s32.totalorder %s481_s21, 2  ;;  %s318_s26 = sand.u32 1, %s469_s18  }
 0x121   : > { %s319_s7 = scalar_lea.sflag [#allocation3], %s318_s26 }
 0x122   : > { %p381_p7 = pnand %p384_p4, %p555_p6 }
 0x124   : > { %p382_p8 = pneg %p381_p7 }
 0x126   : > { %464 = dma.done.wait (%p382_p8), %s319_s7, 128  }
 0x127   : > { %466 = vsyncadd (%p382_p8), %s319_s7, 4294967168  ;;  %p15_p9 = scmp.ge.s32.totalorder %s538_s24, 4   ;;  %s650_s18 = smov %s473_s19 }
 0x128   : > { %s651_s19 = smov %s477_s20  ;;  %s652_s20 = smov %s549_s27 }
 0x129   : > { %s653_s21 = smov %s538_s24  ;;  %17 = sbr.rel (!%p15_p9) target bundleno = 3 (0x3), region = 75 }
 0x12e   :  { %325 = vsyncpa [#allocation3], 1 }
 0x12f   :  { %327 = vsyncpa [#allocation3 + $0x1], 1 }

</bundles_post_ra>
